<compile_context>
chip_gen: v5e
topology: v5e:2x2
jax: 0.10.0
libtpu: 0.0.40
codegen_flags: <defaults>
</compile_context>

<pallas_src>
import functools

import jax
import jax.numpy as jnp
from jax.experimental import pallas as pl
from jax.experimental.pallas import tpu as pltpu


def _round_up(x: int, m: int) -> int:
    return ((x + m - 1) // m) * m


# Explicit scoped-VMEM budget: > v5e's 16 MiB default, == v6e/v7x default, fits v7x's
# 64 MiB physical.  Tiles below are budgeted well under this (2 inputs x 2 buffers).
_VMEM_LIMIT = 32 * 1024 * 1024


# ----------------------------------------------------------------------------
# Kernels
# ----------------------------------------------------------------------------
def _cost_from_params_kernel(params_ref, a_ref, b_ref, cost_ref, acc_ref, *, half_weight):
    """params: [TB, P] bf16, A tile: [TM, P] bf16, b tile: [1, TM] f32 -> cost [TB, 1] f32.

    Grid = (batch tiles, M tiles); M is the reduction axis (last, "arbitrary").
    acc_ref is a lane-dense [TB, TM] f32 accumulator (no per-step cross-lane reduce).
    """
    m = pl.program_id(1)

    @pl.when(m == 0)
    def _():
        acc_ref[...] = jnp.zeros_like(acc_ref)

    # residual tile: r[b, m] = sum_p params[b, p] * A[m, p] - b[m]   (MXU, f32 accumulate)
    r = jax.lax.dot_general(
        params_ref[...], a_ref[...],
        dimension_numbers=(((1,), (1,)), ((), ())),   # contract last dims (no A transpose)
        preferred_element_type=jnp.float32,
    ) - b_ref[...]
    # TrivialLoss rho = r**2, accumulated element-wise (VPU only per step)
    acc_ref[...] += r * r

    @pl.when(m == pl.num_programs(1) - 1)
    def _():
        # single cross-lane reduce + fold 0.5*weight, write output once per batch tile
        cost_ref[...] = half_weight * jnp.sum(acc_ref[...], axis=-1, keepdims=True)


def _cost_from_residuals_kernel(res_ref, cost_ref, acc_ref, *, scale):
    """residual tile [TB, TM] (any float dtype) -> per-row partial cost [TB, 1] f32."""
    m = pl.program_id(1)

    @pl.when(m == 0)
    def _():
        acc_ref[...] = jnp.zeros_like(acc_ref)

    r = res_ref[...].astype(jnp.float32)   # cast per-tile in VMEM (no wrapper HBM copy)
    acc_ref[...] += r * r                  # TrivialLoss

    @pl.when(m == pl.num_programs(1) - 1)
    def _():
        # scale = 0.5*weight  (sum)  or  0.5*weight/numel  (mean), single constant
        cost_ref[...] = scale * jnp.sum(acc_ref[...], axis=-1, keepdims=True)


def _gram_cost_kernel(params_ref, g_ref, h_ref, beta_ref, cost_ref, *, half_weight):
    """Small-batch path: cost = 0.5*weight*(p G p^T - 2 p.h + beta).  All f32, tiny data."""
    p = params_ref[...]                                                  # [B, P]
    q = jnp.dot(p, g_ref[...], preferred_element_type=jnp.float32)      # [B, P] = p @ G
    s = jnp.sum(q * p, axis=-1, keepdims=True)                          # p G p^T
    d = jnp.sum(p * h_ref[...], axis=-1, keepdims=True)                 # p . h
    cost_ref[...] = half_weight * (s - 2.0 * d + beta_ref[0, 0])


# ----------------------------------------------------------------------------
# Python wrapper mirroring BaseCostFunction (linear residual closure + TrivialLoss)
# ----------------------------------------------------------------------------
class BaseCostFunctionPallas:
    name = "BaseCostFunction"

    def __init__(self, A: jnp.ndarray, b: jnp.ndarray):
        # residual_closure(params) := A @ params - b    (A: [M, P], b: [M])
        A = A.astype(jnp.float32)
        b = b.astype(jnp.float32)
        self.A = A
        self.b = b
        self.M, self.P = A.shape

        # Fixed tiling geometry so A / b are padded & cast exactly once.
        self.P_pad = _round_up(self.P, 128)
        self.TM = min(512, _round_up(self.M, 128))
        self.M_pad = _round_up(self.M, self.TM)
        # TODO(synk): add a P (contraction) grid axis if (TM x P_pad) tiles ever exceed
        # the VMEM budget; here P is kept whole per tile.

        A_pad = jnp.pad(A, ((0, self.M_pad - self.M), (0, self.P_pad - self.P)))
        self.A_bf16 = A_pad.astype(jnp.bfloat16)                     # bf16 MXU operand, once
        self.b_row = jnp.pad(b, (0, self.M_pad - self.M)).reshape(1, self.M_pad)

        # Precomputed Gram form for the small-batch / forward() path (kept in f32).
        G = A.T @ A                                                  # [P, P]
        h = A.T @ b                                                  # [P]
        self.G = jnp.pad(G, ((0, self.P_pad - self.P), (0, self.P_pad - self.P)))
        self.h = jnp.pad(h, (0, self.P_pad - self.P)).reshape(1, self.P_pad)
        self.beta = jnp.dot(b, b).reshape(1, 1)

    # -- forward_batch: params_batch [B, P] -> costs [B] -----------------------
    def forward_batch(self, params_batch: jnp.ndarray, weight: float = 1.0,
                      use_gram: bool = False) -> jnp.ndarray:
        B, P = params_batch.shape
        if P != self.P:
            raise ValueError(f"expected n_params={self.P}, got {P}")

        TB = min(128, _round_up(B, 8))
        B_pad = _round_up(B, TB)
        p = params_batch.astype(jnp.float32)
        if (B_pad, self.P_pad) != (B, P):
            p = jnp.pad(p, ((0, B_pad - B), (0, self.P_pad - P)))

        half_weight = 0.5 * float(weight)

        if use_gram:
            # O(B*P^2) algebraic form: avoids streaming all of A for tiny batches.
            costs = pl.pallas_call(
                functools.partial(_gram_cost_kernel, half_weight=half_weight),
                out_shape=jax.ShapeDtypeStruct((B_pad, 1), jnp.float32),
                grid=(1,),
                in_specs=[
                    pl.BlockSpec((B_pad, self.P_pad), lambda i: (0, 0)),
                    pl.BlockSpec((self.P_pad, self.P_pad), lambda i: (0, 0)),
                    pl.BlockSpec((1, self.P_pad), lambda i: (0, 0)),
                    pl.BlockSpec((1, 1), lambda i: (0, 0)),
                ],
                out_specs=pl.BlockSpec((B_pad, 1), lambda i: (0, 0)),
                compiler_params=pltpu.CompilerParams(
                    dimension_semantics=("arbitrary",),
                    vmem_limit_bytes=_VMEM_LIMIT),
            )(p, self.G, self.h, self.beta)
            return costs[:B, 0]

        p_bf16 = p.astype(jnp.bfloat16)
        grid = (B_pad // TB, self.M_pad // self.TM)   # reduction axis (M) last

        costs = pl.pallas_call(
            functools.partial(_cost_from_params_kernel, half_weight=half_weight),
            out_shape=jax.ShapeDtypeStruct((B_pad, 1), jnp.float32),
            grid=grid,
            in_specs=[
                pl.BlockSpec((TB, self.P_pad), lambda bi, mi: (bi, 0)),
                pl.BlockSpec((self.TM, self.P_pad), lambda bi, mi: (mi, 0)),
                pl.BlockSpec((1, self.TM), lambda bi, mi: (0, mi)),
            ],
            out_specs=pl.BlockSpec((TB, 1), lambda bi, mi: (bi, 0)),
            scratch_shapes=[pltpu.VMEM((TB, self.TM), jnp.float32)],
            compiler_params=pltpu.CompilerParams(
                dimension_semantics=("parallel", "arbitrary"),   # batch sharded on 2 TCs (v7x)
                vmem_limit_bytes=_VMEM_LIMIT),
        )(p_bf16, self.A_bf16, self.b_row)
        return costs[:B, 0]

    # -- forward: params [P] -> scalar cost -------------------------------------
    def forward(self, params: jnp.ndarray, weight: float = 1.0) -> jnp.ndarray:
        # B = 1: Gram path avoids reading all of A from HBM for one parameter vector.
        return self.forward_batch(params[None, :], weight=weight, use_gram=True)[0]

    # -- residuals (plain JAX glue — the same closure the kernels fuse) ---------
    def residuals(self, params: jnp.ndarray) -> jnp.ndarray:
        return self.A @ params.astype(jnp.float32) - self.b

    # -- forward_from_residuals: residuals [M] or [B, M] -> scalar cost ---------
    def forward_from_residuals(self, residuals: jnp.ndarray, reduction: str = "sum",
                               weight: float = 1.0) -> jnp.ndarray:
        if reduction not in ("sum", "mean"):
            raise ValueError(f"Invalid reduction: {reduction}")
        r = residuals[None, :] if residuals.ndim == 1 else residuals
        B, M = r.shape
        numel = residuals.size

        TB = min(128, _round_up(B, 8))
        B_pad = _round_up(B, TB)
        TM = min(2048, _round_up(M, 128))
        M_pad = _round_up(M, TM)
        if (B_pad, M_pad) != (B, M):
            r = jnp.pad(r, ((0, B_pad - B), (0, M_pad - M)))  # keeps dtype; zeros add 0 cost

        scale = 0.5 * float(weight)
        if reduction == "mean":
            scale /= float(numel)   # padded zeros contribute 0 to the sum

        grid = (B_pad // TB, M_pad // TM)
        row_costs = pl.pallas_call(
            functools.partial(_cost_from_residuals_kernel, scale=scale),
            out_shape=jax.ShapeDtypeStruct((B_pad, 1), jnp.float32),
            grid=grid,
            in_specs=[pl.BlockSpec((TB, TM), lambda bi, mi: (bi, mi))],
            out_specs=pl.BlockSpec((TB, 1), lambda bi, mi: (bi, 0)),
            scratch_shapes=[pltpu.VMEM((TB, TM), jnp.float32)],
            compiler_params=pltpu.CompilerParams(
                dimension_semantics=("parallel", "arbitrary"),
                vmem_limit_bytes=_VMEM_LIMIT),
        )(r)
        # Module semantics: global sum/mean over the whole residual tensor -> scalar.
        return jnp.sum(row_costs[:B, 0])

    # TODO(synk): jacobian() is an abstract closure hook (jac_closure) with no fixed
    # compute graph in this module; not implemented as a kernel.


# ----------------------------------------------------------------------------
if __name__ == "__main__":
    key = jax.random.PRNGKey(0)
    k_a, k_b, k_p = jax.random.split(key, 3)

    # Small shapes consistent with the module.
    batch_size, n_params, n_residuals = 2, 32, 64
    A = jax.random.normal(k_a, (n_residuals, n_params), dtype=jnp.float32)
    b = jax.random.normal(k_b, (n_residuals,), dtype=jnp.float32)
    params_batch = jax.random.normal(k_p, (batch_size, n_params), dtype=jnp.float32)

    cf = BaseCostFunctionPallas(A, b)

    # Tiled streaming kernel (bf16 MXU inputs, f32 accumulation)
    costs = jax.block_until_ready(cf.forward_batch(params_batch))
    # Gram-form kernel (small-batch path used by forward())
    cost0 = jax.block_until_ready(cf.forward(params_batch[0]))
    costs_gram = jax.block_until_ready(cf.forward_batch(params_batch, use_gram=True))
    # Residual-space kernel (sum / mean reductions, weight folded into scale)
    res = cf.residuals(params_batch[0])
    cost_from_res = jax.block_until_ready(cf.forward_from_residuals(res))
    cost_mean_w = jax.block_until_ready(
        cf.forward_from_residuals(res, reduction="mean", weight=2.0))

    # f32 reference
    r_ref = params_batch @ A.T - b[None, :]
    costs_ref = 0.5 * jnp.sum(r_ref * r_ref, axis=-1)

    assert jnp.allclose(costs, costs_ref, rtol=2e-2, atol=1e-2)        # bf16 MXU inputs
    assert jnp.allclose(costs_gram, costs_ref, rtol=1e-3, atol=1e-3)   # f32 Gram path
    assert jnp.allclose(cost0, costs_ref[0], rtol=1e-3, atol=1e-3)
    assert jnp.allclose(cost_from_res, costs_ref[0], rtol=1e-4, atol=1e-3)
    assert jnp.allclose(cost_mean_w, 2.0 * 0.5 * jnp.mean(r_ref[0] ** 2),
                        rtol=1e-4, atol=1e-3)

    # Secondary check: exercises multi-tile M accumulation + batch/feature padding.
    k2a, k2b, k2p = jax.random.split(jax.random.PRNGKey(1), 3)
    B2, P2, M2 = 10, 40, 1000
    A2 = jax.random.normal(k2a, (M2, P2), dtype=jnp.float32)
    b2 = jax.random.normal(k2b, (M2,), dtype=jnp.float32)
    pb2 = jax.random.normal(k2p, (B2, P2), dtype=jnp.float32)
    cf2 = BaseCostFunctionPallas(A2, b2)

    costs2 = jax.block_until_ready(cf2.forward_batch(pb2, weight=3.0))
    r2 = pb2 @ A2.T - b2[None, :]
    ref2 = 3.0 * 0.5 * jnp.sum(r2 * r2, axis=-1)
    assert jnp.allclose(costs2, ref2, rtol=2e-2, atol=1e-1)

    c2 = jax.block_until_ready(cf2.forward_from_residuals(r2))         # [B, M] residuals
    assert jnp.allclose(c2, 0.5 * jnp.sum(r2 * r2), rtol=1e-4, atol=1e-2)

    print("KERNEL_OK")
</pallas_src>

<mosaic_0001>
module attributes {stable_mosaic.version = 11 : i64} {
  func.func @_cost_from_params_kernel(%arg0: i32, %arg1: i32, %arg2: memref<8x128xbf16, #tpu.memory_space<vmem>>, %arg3: memref<128x128xbf16, #tpu.memory_space<vmem>>, %arg4: memref<1x128xf32, #tpu.memory_space<vmem>>, %arg5: memref<8x1xf32, #tpu.memory_space<vmem>>, %arg6: memref<8x128xf32, #tpu.memory_space<vmem>>) attributes {dimension_semantics = [#tpu.dimension_semantics<parallel>, #tpu.dimension_semantics<arbitrary>], iteration_bounds = array<i64: 1, 1>, scalar_prefetch = 0 : i64, scratch_operands = 1 : i64, tpu.core_type = #tpu.core_type<tc>, window_params = [{transform_indices = @transform_0, window_bounds = array<i64: 8, 128>}, {transform_indices = @transform_1, window_bounds = array<i64: 128, 128>}, {transform_indices = @transform_2, window_bounds = array<i64: 1, 128>}, {transform_indices = @transform_3, window_bounds = array<i64: 8, 1>}]} {
    %c0_i32 = arith.constant 0 : i32
    %0 = arith.cmpi eq, %arg1, %c0_i32 : i32
    %1 = arith.extui %0 : i1 to i32
    %c0_i32_0 = arith.constant 0 : i32
    %2 = arith.cmpi ne, %1, %c0_i32_0 : i32
    scf.if %2 {
      %cst_12 = arith.constant 0.000000e+00 : f32
      %16 = vector.broadcast %cst_12 : f32 to vector<8x128xf32>
      %c0_13 = arith.constant 0 : index
      %c0_14 = arith.constant 0 : index
      %17 = vector.load %arg6[%c0_13, %c0_14] : memref<8x128xf32, #tpu.memory_space<vmem>>, vector<8x128xf32>
      tpu.vector_store %arg6[%c0_13, %c0_14], %16 {strides = array<i32>} : memref<8x128xf32, #tpu.memory_space<vmem>>, vector<8x128xf32>,
    } else {
    }
    %c0 = arith.constant 0 : index
    %c0_1 = arith.constant 0 : index
    %3 = vector.load %arg2[%c0, %c0_1] : memref<8x128xbf16, #tpu.memory_space<vmem>>, vector<8x128xbf16>
    %c0_2 = arith.constant 0 : index
    %c0_3 = arith.constant 0 : index
    %4 = vector.load %arg3[%c0_2, %c0_3] : memref<128x128xbf16, #tpu.memory_space<vmem>>, vector<128x128xbf16>
    %cst = arith.constant dense<0.000000e+00> : vector<8x128xf32>
    %5 = tpu.matmul %3, %4, %cst {dimension_numbers = #tpu.dot_dimension_numbers<[1], [1], [0], [0], [0, 0, 1, 0], [], []>} : vector<8x128xbf16>, vector<128x128xbf16>, vector<8x128xf32> -> vector<8x128xf32>
    %c0_4 = arith.constant 0 : index
    %c0_5 = arith.constant 0 : index
    %6 = vector.load %arg4[%c0_4, %c0_5] : memref<1x128xf32, #tpu.memory_space<vmem>>, vector<1x128xf32>
    %7 = vector.broadcast %6 : vector<1x128xf32> to vector<8x128xf32>
    %8 = arith.subf %5, %7 : vector<8x128xf32>
    %c0_6 = arith.constant 0 : index
    %c0_7 = arith.constant 0 : index
    %9 = vector.load %arg6[%c0_6, %c0_7] : memref<8x128xf32, #tpu.memory_space<vmem>>, vector<8x128xf32>
    %10 = arith.mulf %8, %8 : vector<8x128xf32>
    %11 = arith.addf %9, %10 : vector<8x128xf32>
    %c0_8 = arith.constant 0 : index
    %c0_9 = arith.constant 0 : index
    %12 = vector.load %arg6[%c0_8, %c0_9] : memref<8x128xf32, #tpu.memory_space<vmem>>, vector<8x128xf32>
    tpu.vector_store %arg6[%c0_8, %c0_9], %11 {strides = array<i32>} : memref<8x128xf32, #tpu.memory_space<vmem>>, vector<8x128xf32>,
    %c0_i32_10 = arith.constant 0 : i32
    %13 = arith.cmpi eq, %arg1, %c0_i32_10 : i32
    %14 = arith.extui %13 : i1 to i32
    %c0_i32_11 = arith.constant 0 : i32
    %15 = arith.cmpi ne, %14, %c0_i32_11 : i32
    scf.if %15 {
      %c0_12 = arith.constant 0 : index
      %c0_13 = arith.constant 0 : index
      %16 = vector.load %arg6[%c0_12, %c0_13] : memref<8x128xf32, #tpu.memory_space<vmem>>, vector<8x128xf32>
      %cst_14 = arith.constant dense<0.000000e+00> : vector<8xf32>
      %17 = vector.multi_reduction <add>, %16, %cst_14 [1] : vector<8x128xf32> to vector<8xf32>
      %18 = vector.shape_cast %17 : vector<8xf32> to vector<8x1xf32>
      %cst_15 = arith.constant 5.000000e-01 : f32
      %19 = vector.broadcast %cst_15 : f32 to vector<8x1xf32>
      %20 = arith.mulf %19, %18 : vector<8x1xf32>
      %c0_16 = arith.constant 0 : index
      %c0_17 = arith.constant 0 : index
      %21 = vector.load %arg5[%c0_16, %c0_17] : memref<8x1xf32, #tpu.memory_space<vmem>>, vector<8x1xf32>
      tpu.vector_store %arg5[%c0_16, %c0_17], %20 {strides = array<i32>} : memref<8x1xf32, #tpu.memory_space<vmem>>, vector<8x1xf32>,
    } else {
    }
    return
  }
  func.func @transform_0(%arg0: i32, %arg1: i32) -> (i32, i32) {
    %c0_i32 = arith.constant 0 : i32
    %c0_i32_0 = arith.constant 0 : i32
    return %arg0, %c0_i32 : i32, i32
  }
  func.func @transform_1(%arg0: i32, %arg1: i32) -> (i32, i32) {
    %c0_i32 = arith.constant 0 : i32
    %c0_i32_0 = arith.constant 0 : i32
    return %arg1, %c0_i32 : i32, i32
  }
  func.func @transform_2(%arg0: i32, %arg1: i32) -> (i32, i32) {
    %c0_i32 = arith.constant 0 : i32
    %c0_i32_0 = arith.constant 0 : i32
    return %c0_i32, %arg1 : i32, i32
  }
  func.func @transform_3(%arg0: i32, %arg1: i32) -> (i32, i32) {
    %c0_i32 = arith.constant 0 : i32
    %c0_i32_0 = arith.constant 0 : i32
    return %arg0, %c0_i32 : i32, i32
  }
}

</mosaic_0001>

<bundles_post_ra>
// kernel: tpu_custom_call.1
= control target key start
LH: loop header
LB: loop body
LE: loop exit
PB: predicated region body
PF: predicated region fallthrough
CT: control target
= control target key end

     0   :  { %8 = vsyncpa [#allocation4], 0  ;;  %s284_s0 = inlined_call_operand.hbm [shape: bf16[8,128], index: 0, kind: input, shape index: {}]   ;;  %s285_s1 = inlined_call_operand.hbm [shape: bf16[128,128], index: 1, kind: input, shape index: {}]   ;;  %s286_s2 = inlined_call_operand.vmem [shape: f32[1,128], index: 2, kind: input, shape index: {}]   ;;  %s287_s3 = inlined_call_operand.vmem [shape: f32[8,1], index: 3, kind: output, shape index: {}]  }
   0x1   :  { %s15_s14 = sshll.u32 %s284_s0, 4  ;;  %s16_s14 = int_to_ptr.hbm [resolvable:$true] %s15_s14 }
   0x2   :  { %9 = vsyncpa [#allocation6], 0  ;;  %s248_s15 = smov [#allocation3]   ;;  %s25_s19 = sshll.u32 %s285_s1, 4  ;;  %s26_s19 = int_to_ptr.hbm [resolvable:$true] %s25_s19 }
   0x3   :  { %s17_s16 = sshll.u32 %s248_s15, 4  ;;  %s249_s20 = smov [#allocation5]   ;;  %s18_s16 = int_to_ptr.vmem [resolvable:$true] %s17_s16 }
   0x4   :  { %20 = dma.hbm_to_vmem [thread:$0]  %s16_s14, 64, %s18_s16, [#allocation4]  }
   0x5   :  { %s27_s21 = sshll.u32 %s249_s20, 4  ;;  %s250_s22 = smov 64   ;;  %s28_s21 = int_to_ptr.vmem [resolvable:$true] %s27_s21 }
   0x6   :  { %s251_s23 = smov 4  }
   0x7   :  { %33 = dma.hbm_to_vmem [thread:$0]  %s26_s19, 1024, %s28_s21, [#allocation6], %s250_s22, %s250_s22, %s251_s23  }
   0x8   :  { %244 = dma.done.wait [#allocation4], 64  }
   0x9   :  { %245 = vsyncadd [#allocation4], 4294967232 }
   0xa   :  { %246 = dma.done.wait [#allocation6], 1024  }
   0xb   :  { %247 = vsyncadd [#allocation6], 4294966272  ;;  %v190_v0 = vld [vmem:[#allocation5 + $0x38] sm:$0xff]  ;;  %v189_v1 = vld [vmem:[#allocation5 + $0x30] sm:$0xff]  ;;  %vm143_vm0 = vcmask 7168  }
   0xc   :  { %114 = vmatpush.bf16.xpose.msra.mxu0 %v190_v0  ;;  %v188_v2 = vld [vmem:[#allocation5 + $0x28] sm:$0xff]  ;;  %v187_v3 = vld [vmem:[#allocation5 + $0x20] sm:$0xff]  ;;  %v186_v4 = vld [vmem:[#allocation5 + $0x18] sm:$0xff] }
   0xd   :  { %v185_v5 = vld [vmem:[#allocation5 + $0x10] sm:$0xff]  ;;  %v184_v6 = vld [vmem:[#allocation5 + $0x8] sm:$0xff]  ;;  %v183_v7 = vld [vmem:[#allocation5] sm:$0xff] }
   0xe   :  { %v49_v8 = vld [vmem:[#allocation3] sm:$0xf] }
   0xf   :  { %v195_v9 = vld [vmem:[%s286_s2] ss:$0 sm:$0xff] }
  0x14   :  { %115 = vmatpush.bf16.xpose.msra.mxu0 %v189_v1 }
  0x1c   :  { %116 = vmatpush.bf16.xpose.msra.mxu0 %v188_v2 }
  0x24   :  { %117 = vmatpush.bf16.xpose.msra.mxu0 %v187_v3 }
  0x2c   :  { %118 = vmatpush.bf16.xpose.msra.mxu0 %v186_v4 }
  0x34   :  { %119 = vmatpush.bf16.xpose.msra.mxu0 %v185_v5 }
  0x3c   :  { %120 = vmatpush.bf16.xpose.msra.mxu0 %v184_v6 }
  0x44   :  { %121 = vmatpush.bf16.xpose.msra.mxu0 %v183_v7 }
  0x4b   :  { %122 = vmatmul.bf16.vlgmr.msra.gmra.mxu0 %v49_v8 }
  0xc8   :  { %v123_v10 = vpop.f32.mrf.mxu0 }
  0xc9   :  { %v131_v11 = vsub.f32 %v123_v10, %v195_v9 }
  0xcb   :  { %v133_v12 = vmul.f32 %v131_v11, %v131_v11 }
  0xcd   :  { %140 = vadd.xlane.f32.xlu0 %v133_v12 }
  0xd0   :  { %v125_v13 = vpop.f32.mrf.mxu0 }
 0x140   :  { %v141_v14 = vpop.xlane.xlu0 %140 }
 0x141   :  { %v142_v15 = vmul.f32 0.5, %v141_v14 }
 0x143   :  { %144 = vst.msk [vmem:[%s287_s3] sm:$0xff] %vm143_vm0, %v142_v15 }
 0x144   :  { %149 = vsyncpa [#allocation4], 1 }
 0x145   :  { %150 = vsyncpa [#allocation6], 1 }

</bundles_post_ra>
